<compile_context>
chip_gen: v7x
topology: tpu7x:2x2x1
jax: 0.10.0
libtpu: 0.0.40
codegen_flags: <defaults>
</compile_context>

<pallas_src>
import functools
import math

import jax
import jax.numpy as jnp
from jax import lax
from jax.experimental import pallas as pl
from jax.experimental.pallas import tpu as pltpu


_CHUNK_BYTES = 4 << 20     # ~4 MiB per DMA descriptor
_MAX_INFLIGHT = 4          # DMA descriptors kept in flight


def _dma_slice_kernel(x_hbm, o_hbm, sems, *, src_row0, rows_per_chunk,
                      n_full, rem_rows, n_slots):
    """Copy rows [src_row0, src_row0 + n_out) of x_hbm into o_hbm[0:n_out)
    with chunked HBM->HBM DMAs (no VMEM staging); up to n_slots in flight."""

    def chunk_copy(i, slot, nrows):
        # Chunk i covers output rows [i*rows_per_chunk, i*rows_per_chunk+nrows).
        dst0 = i * rows_per_chunk
        return pltpu.make_async_copy(
            x_hbm.at[pl.ds(src_row0 + dst0, nrows)],
            o_hbm.at[pl.ds(dst0, nrows)],
            sems.at[slot],
        )

    if n_full > 0:
        # Prime the pipeline: up to n_slots descriptors in flight (static loop,
        # n_slots <= _MAX_INFLIGHT <= n_full).
        for s in range(n_slots):
            chunk_copy(s, s, rows_per_chunk).start()

        @pl.loop(0, n_full)
        def _(i):
            slot = i % n_slots
            chunk_copy(i, slot, rows_per_chunk).wait()

            @pl.when(i + n_slots < n_full)
            def _():
                chunk_copy(i + n_slots, slot, rows_per_chunk).start()

    if rem_rows > 0:
        # Tail chunk with a different (static) size; all slots drained above.
        tail = chunk_copy(n_full, 0, rem_rows)
        tail.start()
        tail.wait()


def remove_surrogate(x, dim=0, num_surrogates=1, *, chunk_bytes=_CHUNK_BYTES):
    """Pallas equivalent of RemoveSurrogate.forward: drop the first
    `num_surrogates` slices along `dim`."""
    ndim = x.ndim
    dim = dim % ndim if ndim else 0
    n = x.shape[dim]
    n_out = n - num_surrogates
    assert 0 <= num_surrogates <= n

    if dim != 0:
        # TODO(synk): non-leading dim keeps a non-contiguous region; a plain
        # XLA slice (fusable into the consumer) is the right tool there.
        return lax.slice_in_dim(x, num_surrogates, n, axis=dim)

    rest = x.shape[1:]
    out_shape = (n_out,) + rest
    feat = math.prod(rest)           # == 1 for 1-D inputs
    itemsize = x.dtype.itemsize

    if n_out == 0 or feat == 0:
        # Nothing to copy: zero-size result, no kernel launch.
        return lax.slice_in_dim(x, num_surrogates, n, axis=0)

    # Flatten to an (n, feat) row-major slab (free reshape); the kept rows are
    # one contiguous HBM region, chunked into whole-row DMA descriptors.
    x2 = x.reshape(n, feat)
    row_bytes = feat * itemsize
    rows_per_chunk = min(n_out, max(1, chunk_bytes // row_bytes))
    n_full = n_out // rows_per_chunk                 # >= 1 here
    rem_rows = n_out - n_full * rows_per_chunk
    n_slots = max(1, min(_MAX_INFLIGHT, n_full))

    kernel = functools.partial(
        _dma_slice_kernel,
        src_row0=num_surrogates,
        rows_per_chunk=rows_per_chunk,
        n_full=n_full,
        rem_rows=rem_rows,
        n_slots=n_slots,
    )

    out2 = pl.pallas_call(
        kernel,
        out_shape=jax.ShapeDtypeStruct((n_out, feat), x.dtype),
        in_specs=[pl.BlockSpec(memory_space=pl.ANY)],
        out_specs=pl.BlockSpec(memory_space=pl.ANY),
        scratch_shapes=[pltpu.SemaphoreType.DMA((n_slots,))],
        # Pure memory op: tell XLA's scheduler there is no compute to overlap.
        cost_estimate=pl.CostEstimate(
            flops=0, transcendentals=0,
            bytes_accessed=2 * n_out * feat * itemsize),
    )(x2)
    # TODO(synk): if profiling on v7x shows a single TensorCore's DMA issuance
    # not saturating ~3.2 TB/s HBM, split the chunk range over a size-2
    # "parallel" grid axis so both cores issue descriptors.
    return out2.reshape(out_shape)


if __name__ == "__main__":
    key = jax.random.PRNGKey(0)
    k0, k1, k2 = jax.random.split(key, 3)

    # Small NCHW input consistent with the module's forward.
    x = jax.random.normal(k0, (2, 4, 16, 16), dtype=jnp.float32)
    out = jax.block_until_ready(remove_surrogate(x, dim=0, num_surrogates=1))
    assert out.shape == (1, 4, 16, 16), out.shape
    assert out.dtype == x.dtype
    assert jnp.array_equal(out, x[1:]), "mismatch vs reference narrow"

    # Exercise multi-chunk / in-flight rotation / tail-DMA paths with a tiny
    # chunk target (6 full chunks of 5 rows + 4 remainder rows, 4 in flight).
    y = jax.random.normal(k1, (37, 24), dtype=jnp.float32)
    out_y = jax.block_until_ready(
        remove_surrogate(y, dim=0, num_surrogates=3, chunk_bytes=512))
    assert jnp.array_equal(out_y, y[3:]), "mismatch (chunked path)"

    # Non-128-multiple trailing size + sub-32-bit dtype (same DMA path).
    z = jax.random.normal(k2, (6, 3, 5), dtype=jnp.bfloat16)
    out_z = jax.block_until_ready(remove_surrogate(z, dim=0, num_surrogates=2))
    assert jnp.array_equal(out_z, z[2:]), "mismatch (bf16 / unaligned feat)"

    print("KERNEL_OK")
</pallas_src>

<mosaic_0001>
module attributes {stable_mosaic.version = 11 : i64} {
  func.func @_dma_slice_kernel(%arg0: memref<2x1024xf32, #tpu.memory_space<any>>, %arg1: memref<1x1024xf32, #tpu.memory_space<any>>, %arg2: memref<1x!tpu.dma_semaphore, #tpu.memory_space<semaphore_mem>>) attributes {dimension_semantics = [], scalar_prefetch = 0 : i64, scratch_operands = 1 : i64, tpu.core_type = #tpu.core_type<tc>} {
    %c0_i32 = arith.constant 0 : i32
    %c1_i32 = arith.constant 1 : i32
    %c0_i32_0 = arith.constant 0 : i32
    %0 = tpu.memref_slice %arg0[%c1_i32, %c0_i32_0] : memref<2x1024xf32, #tpu.memory_space<any>> -> memref<1x1024xf32, #tpu.memory_space<any>>
    %c0_i32_1 = arith.constant 0 : i32
    %c0_i32_2 = arith.constant 0 : i32
    %1 = tpu.memref_slice %arg1[%c0_i32_1, %c0_i32_2] : memref<1x1024xf32, #tpu.memory_space<any>> -> memref<1x1024xf32, #tpu.memory_space<any>>
    %2 = tpu.memref_slice %arg2[%c0_i32] : memref<1x!tpu.dma_semaphore, #tpu.memory_space<semaphore_mem>> -> memref<1x!tpu.dma_semaphore, #tpu.memory_space<semaphore_mem>>
    %3 = tpu.memref_squeeze %2 : memref<1x!tpu.dma_semaphore, #tpu.memory_space<semaphore_mem>> -> memref<!tpu.dma_semaphore, #tpu.memory_space<semaphore_mem>>
    tpu.enqueue_dma source(%0 : memref<1x1024xf32, #tpu.memory_space<any>>) target(%1 : memref<1x1024xf32, #tpu.memory_space<any>>) target_semaphore(%3 : memref<!tpu.dma_semaphore, #tpu.memory_space<semaphore_mem>>)
    %c0_i32_3 = arith.constant 0 : i32
    %c1_i32_4 = arith.constant 1 : i32
    %4 = arith.muli %c0_i32_3, %c1_i32_4 : i32
    %c0_i32_5 = arith.constant 0 : i32
    %5 = arith.addi %c0_i32_5, %4 : i32
    %c1_i32_6 = arith.constant 1 : i32
    %c0_i32_7 = arith.constant 0 : i32
    %6 = arith.cmpi eq, %c1_i32_6, %c0_i32_7 : i32
    %c1_i32_8 = arith.constant 1 : i32
    %7 = arith.select %6, %c1_i32_8, %c1_i32_6 : i32
    %8 = arith.remsi %5, %7 : i32
    %c0_i32_9 = arith.constant 0 : i32
    %9 = arith.cmpi ne, %8, %c0_i32_9 : i32
    %c0_i32_10 = arith.constant 0 : i32
    %10 = arith.cmpi slt, %8, %c0_i32_10 : i32
    %c0_i32_11 = arith.constant 0 : i32
    %11 = arith.cmpi slt, %7, %c0_i32_11 : i32
    %12 = arith.xori %10, %11 : i1
    %13 = arith.andi %12, %9 : i1
    %14 = arith.addi %8, %7 : i32
    %15 = arith.select %13, %14, %8 : i32
    %c1_i32_12 = arith.constant 1 : i32
    %16 = arith.muli %5, %c1_i32_12 : i32
    %c1_i32_13 = arith.constant 1 : i32
    %17 = arith.addi %c1_i32_13, %16 : i32
    %c0_i32_14 = arith.constant 0 : i32
    %18 = tpu.memref_slice %arg0[%17, %c0_i32_14] : memref<2x1024xf32, #tpu.memory_space<any>> -> memref<1x1024xf32, #tpu.memory_space<any>>
    %c0_i32_15 = arith.constant 0 : i32
    %19 = tpu.memref_slice %arg1[%16, %c0_i32_15] : memref<1x1024xf32, #tpu.memory_space<any>> -> memref<1x1024xf32, #tpu.memory_space<any>>
    %20 = tpu.memref_slice %arg2[%15] : memref<1x!tpu.dma_semaphore, #tpu.memory_space<semaphore_mem>> -> memref<1x!tpu.dma_semaphore, #tpu.memory_space<semaphore_mem>>
    %21 = tpu.memref_squeeze %20 : memref<1x!tpu.dma_semaphore, #tpu.memory_space<semaphore_mem>> -> memref<!tpu.dma_semaphore, #tpu.memory_space<semaphore_mem>>
    tpu.wait_dma2 semaphore(%21 : memref<!tpu.dma_semaphore, #tpu.memory_space<semaphore_mem>>) src(%18 : memref<1x1024xf32, #tpu.memory_space<any>>) dst(%19 : memref<1x1024xf32, #tpu.memory_space<any>>)
    %c1_i32_16 = arith.constant 1 : i32
    %22 = arith.addi %5, %c1_i32_16 : i32
    %c1_i32_17 = arith.constant 1 : i32
    %23 = arith.cmpi slt, %22, %c1_i32_17 : i32
    %24 = arith.extui %23 : i1 to i32
    %c0_i32_18 = arith.constant 0 : i32
    %25 = arith.cmpi ne, %24, %c0_i32_18 : i32
    scf.if %25 {
      %c1_i32_20 = arith.constant 1 : i32
      %26 = arith.addi %5, %c1_i32_20 : i32
      %c1_i32_21 = arith.constant 1 : i32
      %27 = arith.muli %26, %c1_i32_21 : i32
      %c1_i32_22 = arith.constant 1 : i32
      %28 = arith.addi %c1_i32_22, %27 : i32
      %c0_i32_23 = arith.constant 0 : i32
      %29 = tpu.memref_slice %arg0[%28, %c0_i32_23] : memref<2x1024xf32, #tpu.memory_space<any>> -> memref<1x1024xf32, #tpu.memory_space<any>>
      %c0_i32_24 = arith.constant 0 : i32
      %30 = tpu.memref_slice %arg1[%27, %c0_i32_24] : memref<1x1024xf32, #tpu.memory_space<any>> -> memref<1x1024xf32, #tpu.memory_space<any>>
      %31 = tpu.memref_slice %arg2[%15] : memref<1x!tpu.dma_semaphore, #tpu.memory_space<semaphore_mem>> -> memref<1x!tpu.dma_semaphore, #tpu.memory_space<semaphore_mem>>
      %32 = tpu.memref_squeeze %31 : memref<1x!tpu.dma_semaphore, #tpu.memory_space<semaphore_mem>> -> memref<!tpu.dma_semaphore, #tpu.memory_space<semaphore_mem>>
      tpu.enqueue_dma source(%29 : memref<1x1024xf32, #tpu.memory_space<any>>) target(%30 : memref<1x1024xf32, #tpu.memory_space<any>>) target_semaphore(%32 : memref<!tpu.dma_semaphore, #tpu.memory_space<semaphore_mem>>)
    } else {
    }
    %c1_i32_19 = arith.constant 1 : i32
    return
  }
}

</mosaic_0001>

<bundles_post_ra>
// kernel: tpu_custom_call.1
= control target key start
LH: loop header
LB: loop body
LE: loop exit
PB: predicated region body
PF: predicated region fallthrough
CT: control target
= control target key end

     0   :  { %s44_s9 = smov 32   ;;  %s45_s10 = smov 16   ;;  %s66_s0 = inlined_call_operand.hbm [shape: f32[2,1024], index: 0, kind: input, shape index: {}]   ;;  %s67_s1 = inlined_call_operand.hbm [shape: f32[1,1024], index: 1, kind: output, shape index: {}]  }
   0x1   :  { %s6_s8 = scalar_lea.hbm %s66_s0, 16  ;;  %19 = sst [smem:[#allocation4]] %s44_s9 }
   0x2   :  { %21 = sst [smem:[#allocation4 + $0x1]] %s45_s10  ;;  %s46_s11 = smov 1  }
   0x3   :  { %23 = sst [smem:[#allocation4 + $0x2]] %s46_s11  ;;  %s47_s12 = smov [#allocation2]  }
   0x4   :  { %s48_s13 = smov [#allocation3]   ;;  %s49_s14 = smov 0  }
   0x5   :  { %25 = dma.general %s6_s8, 128, %s67_s1, %s47_s12, %s48_s13, [#allocation4], %s49_s14, 0  }
   0x6   :  { %42 = dma.done.wait [#allocation2], 128 }
   0x7   :  { %43 = vsyncadd [#allocation2], 4294967168 }
   0x8   :  { %29 = vsyncmov [#allocation2] }
   0xb   :  { %s30_s17 = vpop.sfrf %29 }
   0xc   :  { %p35_p0 = scmp.ne.s32.totalorder %s30_s17, 0 }
   0xe   :  { %34 = shalt.err (%p35_p0)  }

</bundles_post_ra>
